<compile_context>
chip_gen: v5e
topology: v5e:2x2
jax: 0.10.0
libtpu: 0.0.40
codegen_flags: <defaults>
</compile_context>

<pallas_src>
import functools

import jax
import jax.numpy as jnp
from jax.experimental import pallas as pl
from jax.experimental.pallas import tpu as pltpu

BN_EPS = 1e-5


def _round_up(x, m):
    return ((x + m - 1) // m) * m


# ----------------------------------------------------------------------------
# Kernel 1 (fused, weights fully resident in VMEM):
#   out_tile = relu(x_tile @ W1 + b1) @ W2' + b2'
# (W2'/b2' already have the eval-mode BatchNorm folded in on the host.)
# ----------------------------------------------------------------------------
def _mlp_fused_kernel(x_ref,    # (TM, IN_P)   f32 or bf16
                      w1_ref,   # (IN_P, H_P)  bf16
                      b1_ref,   # (1, H_P)     f32
                      w2_ref,   # (H_P, OUT_P) bf16 (BN-folded)
                      b2_ref,   # (1, OUT_P)   f32  (BN-folded)
                      o_ref):   # (TM, OUT_P)  out_dtype
    h = jnp.dot(x_ref[...].astype(jnp.bfloat16), w1_ref[...],
                preferred_element_type=jnp.float32) + b1_ref[...]
    h = jnp.maximum(h, 0.0)                      # ReLU, f32 epilogue
    o_ref[...] = (jnp.dot(h.astype(jnp.bfloat16), w2_ref[...],
                          preferred_element_type=jnp.float32)
                  + b2_ref[...]).astype(o_ref.dtype)


# ----------------------------------------------------------------------------
# Kernel 2 (hidden-dimension tiled, for layers whose weights don't fit VMEM):
#   grid = (row tiles, hidden chunks); f32 accumulator in VMEM scratch.
# ----------------------------------------------------------------------------
def _mlp_htiled_kernel(x_ref,    # (TM, IN_P)   f32 or bf16
                       w1_ref,   # (IN_P, TH)   bf16
                       b1_ref,   # (1, TH)      f32
                       w2_ref,   # (TH, OUT_P)  bf16 (BN-folded)
                       b2_ref,   # (1, OUT_P)   f32  (BN-folded)
                       o_ref,    # (TM, OUT_P)  out_dtype
                       acc_ref): # (TM, OUT_P)  f32 scratch
    k = pl.program_id(1)

    @pl.when(k == 0)
    def _():
        acc_ref[...] = jnp.zeros_like(acc_ref)

    h = jnp.dot(x_ref[...].astype(jnp.bfloat16), w1_ref[...],
                preferred_element_type=jnp.float32) + b1_ref[...]
    h = jnp.maximum(h, 0.0)                      # ReLU on this hidden chunk
    acc_ref[...] += jnp.dot(h.astype(jnp.bfloat16), w2_ref[...],
                            preferred_element_type=jnp.float32)

    @pl.when(k == pl.num_programs(1) - 1)
    def _():
        o_ref[...] = (acc_ref[...] + b2_ref[...]).astype(o_ref.dtype)


# ----------------------------------------------------------------------------
# One-time parameter preparation: fold eval-mode BN into lin2, pad feature
# axes to lane-dense multiples of `feature_align` (128; 256 can be preferable
# on v6e/v7x when the layer is compute-bound), cast weights to bf16.
# ----------------------------------------------------------------------------
def prepare_params(params, *, feature_align=128):
    in_f, h_f = params["w1"].shape
    out_f = params["w2"].shape[1]

    # bn(z) = z*scale + shift; bn(relu(lin1)) @ W2 + b2
    #       = relu(lin1) @ (scale[:,None]*W2) + (shift @ W2 + b2)
    scale = params["bn_gamma"] * jax.lax.rsqrt(params["bn_var"] + BN_EPS)
    shift = params["bn_beta"] - params["bn_mean"] * scale
    w2_f = params["w2"] * scale[:, None]
    b2_f = params["b2"] + shift @ params["w2"]

    IN_P = _round_up(in_f, feature_align)
    H_P = _round_up(h_f, feature_align)
    OUT_P = _round_up(out_f, feature_align)

    w1_p = jnp.zeros((IN_P, H_P), jnp.bfloat16).at[:in_f, :h_f].set(
        params["w1"].astype(jnp.bfloat16))
    b1_p = jnp.zeros((1, H_P), jnp.float32).at[:, :h_f].set(params["b1"][None, :])
    w2_p = jnp.zeros((H_P, OUT_P), jnp.bfloat16).at[:h_f, :out_f].set(
        w2_f.astype(jnp.bfloat16))
    b2_p = jnp.zeros((1, OUT_P), jnp.float32).at[:, :out_f].set(b2_f[None, :])

    prep = {"w1": w1_p, "b1": b1_p, "w2": w2_p, "b2": b2_p}
    return prep, (in_f, h_f, out_f)


# ----------------------------------------------------------------------------
# Jitted forward: picks row tiling, the fused vs hidden-tiled path, VMEM limit.
# ----------------------------------------------------------------------------
@functools.partial(
    jax.jit,
    static_argnames=("out_f", "block_rows", "out_dtype", "force_hidden_tiling"))
def mlp_forward(x, prep, *, out_f, block_rows=512, out_dtype=jnp.bfloat16,
                force_hidden_tiling=False):
    B, in_f = x.shape
    w1, b1, w2, b2 = prep["w1"], prep["b1"], prep["w2"], prep["b2"]
    IN_P, H_P = w1.shape
    OUT_P = w2.shape[1]

    # Row tile: sublane-aligned, and small enough that the grid has >= 2 steps
    # (megacore sharding on v7x + DMA/compute overlap even at small batch).
    TM = max(8, min(block_rows, _round_up(pl.cdiv(B, 2), 8)))
    Bp = _round_up(B, TM)

    # Feed x directly (f32 -> bf16 cast on the VPU inside the kernel) when no
    # padding is needed; otherwise a single fused pad+cast-to-bf16 pass.
    if (B, in_f) == (Bp, IN_P):
        x_in = x
    else:
        x_in = jnp.zeros((Bp, IN_P), jnp.bfloat16).at[:B, :in_f].set(
            x.astype(jnp.bfloat16))

    x_bytes = jnp.dtype(x_in.dtype).itemsize
    out_bytes = jnp.dtype(out_dtype).itemsize

    # Advisory cost for XLA scheduling around the custom call.
    flops = 2 * Bp * (IN_P * H_P + H_P * OUT_P)
    bytes_accessed = (Bp * IN_P * x_bytes + Bp * OUT_P * out_bytes
                      + IN_P * H_P * 2 + H_P * OUT_P * 2 + (H_P + OUT_P) * 4)
    cost = pl.CostEstimate(flops=flops, bytes_accessed=bytes_accessed,
                           transcendentals=0)

    # True fused-path footprint: double-buffered x/out tiles, single-buffered
    # resident weights (pl.Buffered(1)), biases, f32 hidden + its bf16 copy.
    fused_bytes = (2 * TM * IN_P * x_bytes
                   + 2 * TM * OUT_P * out_bytes
                   + IN_P * H_P * 2
                   + H_P * OUT_P * 2
                   + (H_P + OUT_P) * 4
                   + TM * H_P * 4
                   + TM * H_P * 2)

    use_fused = (not force_hidden_tiling) and fused_bytes <= (28 << 20)

    if use_fused:
        # Never below the 32 MiB default; cap at 40 MiB (v7x has 64 MiB total).
        vmem_limit = int(min(max(2 * fused_bytes + (8 << 20), 32 << 20),
                             40 << 20))
        resident = pl.Buffered(buffer_count=1)   # no double-buffer for weights
        out_p = pl.pallas_call(
            _mlp_fused_kernel,
            out_shape=jax.ShapeDtypeStruct((Bp, OUT_P), out_dtype),
            grid=(Bp // TM,),
            in_specs=[
                pl.BlockSpec((TM, IN_P), lambda i: (i, 0)),          # x tile
                pl.BlockSpec((IN_P, H_P), lambda i: (0, 0),
                             pipeline_mode=resident),                # W1
                pl.BlockSpec((1, H_P), lambda i: (0, 0),
                             pipeline_mode=resident),                # b1
                pl.BlockSpec((H_P, OUT_P), lambda i: (0, 0),
                             pipeline_mode=resident),                # W2'
                pl.BlockSpec((1, OUT_P), lambda i: (0, 0),
                             pipeline_mode=resident),                # b2'
            ],
            out_specs=pl.BlockSpec((TM, OUT_P), lambda i: (i, 0)),
            compiler_params=pltpu.CompilerParams(
                dimension_semantics=("parallel",),
                vmem_limit_bytes=vmem_limit),
            cost_estimate=cost,
        )(x_in, w1, b1, w2, b2)
    else:
        # Hidden-dimension tiling: caps VMEM at O(TM*TH + IN_P*TH + TH*OUT_P).
        TH = 128
        for cand in (1024, 512, 256):
            if H_P % cand == 0:
                TH = cand
                break
        htiled_bytes = (2 * TM * IN_P * x_bytes
                        + 2 * TM * OUT_P * out_bytes
                        + 2 * IN_P * TH * 2 + 2 * TH * OUT_P * 2
                        + 2 * (TH + OUT_P) * 4
                        + TM * OUT_P * 4        # f32 accumulator scratch
                        + TM * TH * 4 + TM * TH * 2)
        vmem_limit = int(min(max(2 * htiled_bytes + (8 << 20), 32 << 20),
                             40 << 20))
        out_p = pl.pallas_call(
            _mlp_htiled_kernel,
            out_shape=jax.ShapeDtypeStruct((Bp, OUT_P), out_dtype),
            grid=(Bp // TM, H_P // TH),
            in_specs=[
                pl.BlockSpec((TM, IN_P), lambda i, k: (i, 0)),   # x tile
                pl.BlockSpec((IN_P, TH), lambda i, k: (0, k)),   # W1 chunk
                pl.BlockSpec((1, TH), lambda i, k: (0, k)),      # b1 chunk
                pl.BlockSpec((TH, OUT_P), lambda i, k: (k, 0)),  # W2' chunk
                pl.BlockSpec((1, OUT_P), lambda i, k: (0, 0)),   # b2'
            ],
            out_specs=pl.BlockSpec((TM, OUT_P), lambda i, k: (i, 0)),
            scratch_shapes=[pltpu.VMEM((TM, OUT_P), jnp.float32)],
            compiler_params=pltpu.CompilerParams(
                dimension_semantics=("parallel", "arbitrary"),
                vmem_limit_bytes=vmem_limit),
            cost_estimate=cost,
        )(x_in, w1, b1, w2, b2)

    return out_p[:B, :out_f]


# ----------------------------------------------------------------------------
# Plain-JAX glue: parameter init + fp32 reference for validation.
# ----------------------------------------------------------------------------
def init_params(key, in_f, h_f, out_f):
    ks = jax.random.split(key, 8)
    lim1 = 1.0 / jnp.sqrt(in_f)
    lim2 = 1.0 / jnp.sqrt(h_f)
    return {
        # nn.Linear-style uniform init (weights stored as (in, out))
        "w1": jax.random.uniform(ks[0], (in_f, h_f), jnp.float32, -lim1, lim1),
        "b1": jax.random.uniform(ks[1], (h_f,), jnp.float32, -lim1, lim1),
        "w2": jax.random.uniform(ks[2], (h_f, out_f), jnp.float32, -lim2, lim2),
        "b2": jax.random.uniform(ks[3], (out_f,), jnp.float32, -lim2, lim2),
        # non-trivial BN stats so the host-side folding is actually exercised
        "bn_gamma": jax.random.uniform(ks[4], (h_f,), jnp.float32, 0.5, 1.5),
        "bn_beta": 0.1 * jax.random.normal(ks[5], (h_f,), jnp.float32),
        "bn_mean": 0.1 * jax.random.normal(ks[6], (h_f,), jnp.float32),
        "bn_var": jax.random.uniform(ks[7], (h_f,), jnp.float32, 0.5, 1.5),
    }


def mlp_reference(x, params):
    h = jnp.maximum(x @ params["w1"] + params["b1"], 0.0)
    h = ((h - params["bn_mean"]) * jax.lax.rsqrt(params["bn_var"] + BN_EPS)
         * params["bn_gamma"] + params["bn_beta"])
    # dropout: identity in eval mode
    return h @ params["w2"] + params["b2"]


def _tolerance(ref, in_f, h_f):
    # bf16 operands with f32 accumulation: error grows roughly ~sqrt(K)*2^-9,
    # scaled by the output magnitude (width-scaled check).
    scale = float(jnp.max(jnp.abs(ref))) + 1.0
    return 2.0 ** -9 * (in_f ** 0.5 + h_f ** 0.5 + 4.0) * scale


if __name__ == "__main__":
    key = jax.random.PRNGKey(0)

    # --- Test 1: small shapes requiring padding (batch=16, 32 -> 64 -> 4). ---
    B, in_f, h_f, out_f = 16, 32, 64, 4
    k_x, k_p = jax.random.split(key)
    x = jax.random.normal(k_x, (B, in_f), jnp.float32)
    params = init_params(k_p, in_f, h_f, out_f)
    prep, (_, _, out_f_true) = prepare_params(params)
    ref = mlp_reference(x, params)
    tol = _tolerance(ref, in_f, h_f)

    out = mlp_forward(x, prep, out_f=out_f_true)
    jax.block_until_ready(out)
    assert out.shape == (B, out_f)
    err = float(jnp.max(jnp.abs(out.astype(jnp.float32) - ref)))
    assert err < tol, f"fused path: max abs err {err} (tol {tol})"

    # Same inputs through the hidden-dim-tiled path (forced) to validate it.
    out_t = mlp_forward(x, prep, out_f=out_f_true, force_hidden_tiling=True)
    jax.block_until_ready(out_t)
    err_t = float(jnp.max(jnp.abs(out_t.astype(jnp.float32) - ref)))
    assert err_t < tol, f"hidden-tiled path: max abs err {err_t} (tol {tol})"

    # --- Test 2: lane-aligned shapes -> exercises the no-pad fast path. ------
    B2, in2, h2, o2 = 16, 128, 256, 128
    k_x2, k_p2 = jax.random.split(jax.random.PRNGKey(1))
    x2 = jax.random.normal(k_x2, (B2, in2), jnp.float32)
    params2 = init_params(k_p2, in2, h2, o2)
    prep2, (_, _, o2_true) = prepare_params(params2)
    ref2 = mlp_reference(x2, params2)
    tol2 = _tolerance(ref2, in2, h2)

    out2 = mlp_forward(x2, prep2, out_f=o2_true)
    jax.block_until_ready(out2)
    assert out2.shape == (B2, o2)
    err2 = float(jnp.max(jnp.abs(out2.astype(jnp.float32) - ref2)))
    assert err2 < tol2, f"aligned path: max abs err {err2} (tol {tol2})"

    print("KERNEL_OK")
</pallas_src>

<mosaic_0001>
module attributes {stable_mosaic.version = 11 : i64} {
  func.func @_mlp_fused_kernel(%arg0: i32, %arg1: memref<8x128xbf16, #tpu.memory_space<vmem>>, %arg2: memref<128x128xbf16, #tpu.memory_space<vmem>>, %arg3: memref<1x128xf32, #tpu.memory_space<vmem>>, %arg4: memref<128x128xbf16, #tpu.memory_space<vmem>>, %arg5: memref<1x128xf32, #tpu.memory_space<vmem>>, %arg6: memref<8x128xbf16, #tpu.memory_space<vmem>>) attributes {dimension_semantics = [#tpu.dimension_semantics<parallel>], iteration_bounds = array<i64: 2>, scalar_prefetch = 0 : i64, scratch_operands = 0 : i64, tpu.core_type = #tpu.core_type<tc>, window_params = [{transform_indices = @transform_0, window_bounds = array<i64: 8, 128>}, {pipeline_mode = #tpu.pipeline_mode<synchronous>, transform_indices = @transform_1, window_bounds = array<i64: 128, 128>}, {pipeline_mode = #tpu.pipeline_mode<synchronous>, transform_indices = @transform_2, window_bounds = array<i64: 1, 128>}, {pipeline_mode = #tpu.pipeline_mode<synchronous>, transform_indices = @transform_3, window_bounds = array<i64: 128, 128>}, {pipeline_mode = #tpu.pipeline_mode<synchronous>, transform_indices = @transform_4, window_bounds = array<i64: 1, 128>}, {transform_indices = @transform_5, window_bounds = array<i64: 8, 128>}]} {
    %c0 = arith.constant 0 : index
    %c0_0 = arith.constant 0 : index
    %0 = vector.load %arg1[%c0, %c0_0] : memref<8x128xbf16, #tpu.memory_space<vmem>>, vector<8x128xbf16>
    %c0_1 = arith.constant 0 : index
    %c0_2 = arith.constant 0 : index
    %1 = vector.load %arg2[%c0_1, %c0_2] : memref<128x128xbf16, #tpu.memory_space<vmem>>, vector<128x128xbf16>
    %cst = arith.constant dense<0.000000e+00> : vector<8x128xf32>
    %2 = tpu.matmul %0, %1, %cst {dimension_numbers = #tpu.dot_dimension_numbers<[1], [0], [0], [1], [0, 0, 1, 1], [], []>} : vector<8x128xbf16>, vector<128x128xbf16>, vector<8x128xf32> -> vector<8x128xf32>
    %c0_3 = arith.constant 0 : index
    %c0_4 = arith.constant 0 : index
    %3 = vector.load %arg3[%c0_3, %c0_4] : memref<1x128xf32, #tpu.memory_space<vmem>>, vector<1x128xf32>
    %4 = vector.broadcast %3 : vector<1x128xf32> to vector<8x128xf32>
    %5 = arith.addf %2, %4 : vector<8x128xf32>
    %cst_5 = arith.constant 0.000000e+00 : f32
    %6 = vector.broadcast %cst_5 : f32 to vector<8x128xf32>
    %7 = arith.maximumf %5, %6 : vector<8x128xf32>
    %8 = arith.truncf %7 : vector<8x128xf32> to vector<8x128xbf16>
    %c0_6 = arith.constant 0 : index
    %c0_7 = arith.constant 0 : index
    %9 = vector.load %arg4[%c0_6, %c0_7] : memref<128x128xbf16, #tpu.memory_space<vmem>>, vector<128x128xbf16>
    %cst_8 = arith.constant dense<0.000000e+00> : vector<8x128xf32>
    %10 = tpu.matmul %8, %9, %cst_8 {dimension_numbers = #tpu.dot_dimension_numbers<[1], [0], [0], [1], [0, 0, 1, 1], [], []>} : vector<8x128xbf16>, vector<128x128xbf16>, vector<8x128xf32> -> vector<8x128xf32>
    %c0_9 = arith.constant 0 : index
    %c0_10 = arith.constant 0 : index
    %11 = vector.load %arg5[%c0_9, %c0_10] : memref<1x128xf32, #tpu.memory_space<vmem>>, vector<1x128xf32>
    %12 = vector.broadcast %11 : vector<1x128xf32> to vector<8x128xf32>
    %13 = arith.addf %10, %12 : vector<8x128xf32>
    %14 = arith.truncf %13 : vector<8x128xf32> to vector<8x128xbf16>
    %c0_11 = arith.constant 0 : index
    %c0_12 = arith.constant 0 : index
    %15 = vector.load %arg6[%c0_11, %c0_12] : memref<8x128xbf16, #tpu.memory_space<vmem>>, vector<8x128xbf16>
    tpu.vector_store %arg6[%c0_11, %c0_12], %14 {strides = array<i32>} : memref<8x128xbf16, #tpu.memory_space<vmem>>, vector<8x128xbf16>,
    return
  }
  func.func @transform_0(%arg0: i32) -> (i32, i32) {
    %c0_i32 = arith.constant 0 : i32
    %c0_i32_0 = arith.constant 0 : i32
    return %arg0, %c0_i32 : i32, i32
  }
  func.func @transform_1(%arg0: i32) -> (i32, i32) {
    %c0_i32 = arith.constant 0 : i32
    %c0_i32_0 = arith.constant 0 : i32
    %c0_i32_1 = arith.constant 0 : i32
    return %c0_i32, %c0_i32_0 : i32, i32
  }
  func.func @transform_2(%arg0: i32) -> (i32, i32) {
    %c0_i32 = arith.constant 0 : i32
    %c0_i32_0 = arith.constant 0 : i32
    %c0_i32_1 = arith.constant 0 : i32
    return %c0_i32, %c0_i32_0 : i32, i32
  }
  func.func @transform_3(%arg0: i32) -> (i32, i32) {
    %c0_i32 = arith.constant 0 : i32
    %c0_i32_0 = arith.constant 0 : i32
    %c0_i32_1 = arith.constant 0 : i32
    return %c0_i32, %c0_i32_0 : i32, i32
  }
  func.func @transform_4(%arg0: i32) -> (i32, i32) {
    %c0_i32 = arith.constant 0 : i32
    %c0_i32_0 = arith.constant 0 : i32
    %c0_i32_1 = arith.constant 0 : i32
    return %c0_i32, %c0_i32_0 : i32, i32
  }
  func.func @transform_5(%arg0: i32) -> (i32, i32) {
    %c0_i32 = arith.constant 0 : i32
    %c0_i32_0 = arith.constant 0 : i32
    return %arg0, %c0_i32 : i32, i32
  }
}

</mosaic_0001>

<bundles_post_ra>
// kernel: mlp_forward.1
= control target key start
LH: loop header
LB: loop body
LE: loop exit
PB: predicated region body
PF: predicated region fallthrough
CT: control target
= control target key end

     0   :  { %10 = vsyncpa [#allocation3], 0  ;;  %s784_s0 = inlined_call_operand.vmem [shape: bf16[16,128], index: 0, kind: input, shape index: {}]   ;;  %s785_s1 = inlined_call_operand.hbm [shape: bf16[128,128], index: 1, kind: input, shape index: {}]   ;;  %s786_s2 = inlined_call_operand.vmem [shape: f32[1,128], index: 2, kind: input, shape index: {}]   ;;  %s787_s3 = inlined_call_operand.hbm [shape: bf16[128,128], index: 3, kind: input, shape index: {}]   ;;  %s788_s4 = inlined_call_operand.vmem [shape: f32[1,128], index: 4, kind: input, shape index: {}]   ;;  %s789_s5 = inlined_call_operand.vmem [shape: bf16[16,128], index: 5, kind: output, shape index: {}]  }
   0x1   :  { %11 = vsyncpa [#allocation5], 0  ;;  %s732_s18 = smov 0  }
   0x2 LB: > { %s169_s21 = sshll.u32 %s785_s1, 4  ;;  %s741_s22 = sadd.s32 4294967295, %s696_s18   ;;  %s696_s18 = sphi %s732_s18, %s17_s18   ;;  %s170_s21 = int_to_ptr.hbm [resolvable:$true] %s169_s21 }
   0x3   : > { %p498_p0 = scmp.ge.s32.totalorder %s696_s18, 1  ;;  %p158_p1 = scmp.lt.s32.totalorder %s696_s18, 3 }
   0x4   : > { %p604_p2 = scmp.eq.s32.totalorder %s741_s22, 0  ;;  %s698_s24 = smov [#allocation2]  }
   0x5   : > { %p746_p3 = pnand %p498_p0, %p158_p1  ;;  %s171_s25 = sshll.u32 %s698_s24, 4  ;;  %s172_s25 = int_to_ptr.vmem [resolvable:$true] %s171_s25 }
   0x6   : > { %s186_s28 = sshll.u32 %s787_s3, 4  ;;  %s699_s29 = smov [#allocation4]   ;;  %s187_s28 = int_to_ptr.hbm [resolvable:$true] %s186_s28 }
   0x7   : > { %p597_p4 = pneg %p746_p3  ;;  %s188_s30 = sshll.u32 %s699_s29, 4  ;;  %s189_s30 = int_to_ptr.vmem [resolvable:$true] %s188_s30 }
   0x8   : > { %s700_s6 = smov 64   ;;  %s701_s7 = smov 4  }
   0x9   : > { %p598_p5 = pnand %p604_p2, %p597_p4  ;;  %214 = sbr.rel (%p746_p3) target bundleno = 315 (0x13b), region = 40 }
   0xb   : > { %600 = dma.hbm_to_vmem [thread:$0]  (!%p598_p5), %s170_s21, 1024, %s172_s25, [#allocation3], %s700_s6, %s700_s6, %s701_s7  }
   0xc   : > { %603 = dma.hbm_to_vmem [thread:$0]  (!%p598_p5), %s187_s28, 1024, %s189_s30, [#allocation5], %s700_s6, %s700_s6, %s701_s7  }
   0xe   : > { %687 = dma.done.wait (%p604_p2), [#allocation3], 1024  }
   0xf   : > { %689 = vsyncadd (%p604_p2), [#allocation3], 4294966272 }
  0x10   : > { %691 = dma.done.wait (%p604_p2), [#allocation5], 1024  }
  0x11   : > { %693 = vsyncadd (%p604_p2), [#allocation5], 4294966272  ;;  %v580_v0 = vld [vmem:[#allocation2 + $0x38] sm:$0xff]  ;;  %v579_v1 = vld [vmem:[#allocation2 + $0x30] sm:$0xff]  ;;  %p246_p6 = scmp.lt.s32.totalorder %s741_s22, 1 }
  0x12   : > { %323 = vmatpush.bf16.msra.mxu0 %v580_v0  ;;  %v588_v2 = vld [vmem:[#allocation4 + $0x38] sm:$0xff]  ;;  %v587_v3 = vld [vmem:[#allocation4 + $0x30] sm:$0xff]  ;;  %v578_v4 = vld [vmem:[#allocation2 + $0x28] sm:$0xff] }
  0x13   : > { %406 = vmatpush.bf16.msra.mxu1 %v588_v2  ;;  %v586_v5 = vld [vmem:[#allocation4 + $0x28] sm:$0xff]  ;;  %v577_v6 = vld [vmem:[#allocation2 + $0x20] sm:$0xff]  ;;  %v576_v8 = vld [vmem:[#allocation2 + $0x18] sm:$0xff]  ;;  %s792_s22 = smov (!%p246_p6, %s741_s22), 1 }
  0x14   : > { %v585_v7 = vld [vmem:[#allocation4 + $0x20] sm:$0xff]  ;;  %v584_v9 = vld [vmem:[#allocation4 + $0x18] sm:$0xff]  ;;  %v575_v10 = vld [vmem:[#allocation2 + $0x10] sm:$0xff]  ;;  %s505_s8 = sshll.u32 %s792_s22, 2 }
  0x15   : > { %v583_v11 = vld [vmem:[#allocation4 + $0x10] sm:$0xff]  ;;  %v574_v12 = vld [vmem:[#allocation2 + $0x8] sm:$0xff]  ;;  %v573_v13 = vld [vmem:[#allocation2] sm:$0xff]  ;;  %s249_s11 = scalar_lea.vmem %s784_s0, %s505_s8  ;;  %s253_s19 = scalar_lea.vmem %s789_s5, %s505_s8 }
  0x16   : > { %324 = vmatpush.bf16.msra.mxu0 %v579_v1  ;;  %v254_v14 = vld [vmem:[%s249_s11] sm:$0xf]  ;;  %v582_v15 = vld [vmem:[#allocation4 + $0x8] sm:$0xff] }
  0x17   : > { %407 = vmatpush.bf16.msra.mxu1 %v587_v3  ;;  %v581_v16 = vld [vmem:[#allocation4] sm:$0xff] }
  0x18   : > { %v620_v17 = vld [vmem:[%s786_s2] ss:$0 sm:$0xff] }
  0x19   : > { %v621_v23 = vld [vmem:[%s788_s4] ss:$0 sm:$0xff] }
  0x1a   : > { %325 = vmatpush.bf16.msra.mxu0 %v578_v4 }
  0x1b   : > { %408 = vmatpush.bf16.msra.mxu1 %v586_v5 }
  0x1e   : > { %326 = vmatpush.bf16.msra.mxu0 %v577_v6 }
  0x1f   : > { %409 = vmatpush.bf16.msra.mxu1 %v585_v7 }
  0x22   : > { %327 = vmatpush.bf16.msra.mxu0 %v576_v8 }
  0x23   : > { %410 = vmatpush.bf16.msra.mxu1 %v584_v9 }
  0x26   : > { %328 = vmatpush.bf16.msra.mxu0 %v575_v10 }
  0x27   : > { %411 = vmatpush.bf16.msra.mxu1 %v583_v11 }
  0x2a   : > { %329 = vmatpush.bf16.msra.mxu0 %v574_v12 }
  0x2b   : > { %412 = vmatpush.bf16.msra.mxu1 %v582_v15 }
  0x2e   : > { %330 = vmatpush.bf16.msra.mxu0 %v573_v13 }
  0x2f   : > { %413 = vmatpush.bf16.msra.mxu1 %v581_v16 }
  0x31   : > { %331 = vmatmul.bf16.vlgmr.msra.gmra.mxu0 %v254_v14 }
  0xae   : > { %v332_v18 = vpop.f32.mrf.mxu0 }
  0xaf   : > { %v333_v19 = vadd.f32 %v620_v17, %v332_v18 }
  0xb1   : > { %v336_v20 = vmax.f32 %v333_v19, 0.0 }
  0xb3   : > { %v337_v21 = vpack.c.bf16 %v336_v20, %v336_v20 }
  0xb5   : > { %414 = vmatmul.bf16.vlgmr.msra.gmra.mxu1 %v337_v21 }
  0xb6   : > { %v334_v22 = vpop.f32.mrf.mxu0 }
 0x132   : > { %v415_v24 = vpop.f32.mrf.mxu1 }
 0x133   : > { %v416_v25 = vadd.f32 %v621_v23, %v415_v24 }
 0x135   : > { %v419_v26 = vpack.c.bf16 %v416_v25, %v416_v25 }
 0x137   : > { %420 = vst [vmem:[%s253_s19] sm:$0xf] %v419_v26 }
 0x13a   : > { %v417_v27 = vpop.f32.mrf.mxu1 }
 0x13b PF: > { %s17_s18 = sadd.s32 1, %s696_s18  }
 0x13c   : > { %p14_p7 = scmp.ge.s32.totalorder %s17_s18, 4  }
 0x13e   :  { %16 = sbr.rel (!%p14_p7) target bundleno = 2 (0x2), region = 79 }
 0x143   :  { %440 = vsyncpa [#allocation3], 1 }
 0x144   :  { %442 = vsyncpa [#allocation3 + $0x1], 1 }
 0x145   :  { %443 = vsyncpa [#allocation5], 1 }

</bundles_post_ra>
